<compile_context>
chip_gen: v7x
topology: tpu7x:2x2x1
jax: 0.10.0
libtpu: 0.0.40
codegen_flags: <defaults>
</compile_context>

<pallas_src>
import jax
import jax.numpy as jnp
from jax import lax
from jax.experimental import pallas as pl
from jax.experimental.pallas import tpu as pltpu

_EPS = 1e-5  # nn.InstanceNorm2d default eps


def _make_kernel(B, C, H, W):
    HW = H * W

    def kernel(x_ref, w1_ref, w2_ref, out_ref):
        # x_ref / out_ref: (B, C, HW)   w*_ref: (C, 9*C), column index = k*C + ci,
        # tap index k = kh*3 + kw (matches HWIO flattening used in the wrapper).
        #
        # Reflection fix-up masks at the full (C, HW) tile shape, built once per
        # grid step (JAX does not CSE broadcast_in_dim -> never broadcast inside
        # the per-tap jnp.where calls).
        p = lax.broadcasted_iota(jnp.int32, (C, HW), 1)   # flat pixel index y*W+x
        col = p % W
        is_x_lo = col == 0
        is_x_hi = col == (W - 1)
        is_y_lo = p < W
        is_y_hi = p >= (H - 1) * W

        w1 = w1_ref[...]          # (C, 9*C) f32, loaded once per grid step
        w2 = w2_ref[...]

        def conv3x3(src, w_flat):
            """3x3 'same' conv with reflection pad; channel mix on the MXU."""
            # Shared XLU rolls (cheap: XLU slot != VALU slot) + masked selects.
            col_m1 = pltpu.roll(src, 1, 1)        # [p] = src[p-1] -> column x-1
            col_p1 = pltpu.roll(src, HW - 1, 1)   # [p] = src[p+1] -> column x+1
            horiz = (
                jnp.where(is_x_lo, col_p1, col_m1),   # kw=0: x-1 (reflect 0 -> 1)
                src,                                   # kw=1: x
                jnp.where(is_x_hi, col_m1, col_p1),   # kw=2: x+1 (reflect W-1 -> W-2)
            )
            taps = [None] * 9
            for kw, h in enumerate(horiz):
                row_m1 = pltpu.roll(h, W, 1)          # [p] = h[p-W] -> row y-1
                row_p1 = pltpu.roll(h, HW - W, 1)     # [p] = h[p+W] -> row y+1
                taps[0 * 3 + kw] = jnp.where(is_y_lo, row_p1, row_m1)  # reflect 0 -> 1
                taps[1 * 3 + kw] = h
                taps[2 * 3 + kw] = jnp.where(is_y_hi, row_m1, row_p1)  # reflect H-1 -> H-2
            tcat = jnp.concatenate(taps, axis=0)      # (9*C, HW), lane-dense
            # Single MXU matmul replaces 9*C broadcast-FMAs on the VPU.
            return jnp.dot(w_flat, tcat, preferred_element_type=jnp.float32)

        def instance_norm(h):
            # per-(n,c) stats over H*W, biased variance, no affine; the centered
            # value is reused for the output.
            mean = jnp.mean(h, axis=1, keepdims=True)
            c = h - mean
            var = jnp.mean(c * c, axis=1, keepdims=True)
            return c * lax.rsqrt(var + _EPS)

        for b in range(B):  # B is small; masks/weights are reused across images
            x = x_ref[b].astype(jnp.float32)                          # (C, HW)
            h = jnp.maximum(instance_norm(conv3x3(x, w1)), 0.0)       # ReLU(inplace)
            h = instance_norm(conv3x3(h, w2))
            out_ref[b] = (x + h).astype(out_ref.dtype)

    return kernel


def _images_per_step(N, C, HW, itemsize):
    """Largest divisor of N giving a decent block while keeping >=2 grid steps
    (v7x has 2 TensorCores; a single grid step would serialize onto one)."""
    budget = 1 << 20  # ~1 MiB of activations per block (x2 dbl-buffer, in+out)
    best = 1
    for b in range(1, N + 1):
        if N % b:
            continue
        if N >= 2 and N // b < 2:
            continue
        if b * C * HW * itemsize > budget:
            continue
        best = b
    return best


def residual_block(x_nchw, w1_hwio, b1, w2_hwio, b2):
    """PyTorch-facing: x (N,C,H,W) NCHW; w* HWIO (3,3,Cin,Cout); b* (Cout,).

    b1/b2 are accepted for API parity but unused: with InstanceNorm2d(affine=False)
    a per-channel conv bias is exactly cancelled by the per-(n,c) mean subtraction.
    """
    del b1, b2
    N, C, H, W = x_nchw.shape
    assert H >= 2 and W >= 2, "reflection padding requires H >= 2 and W >= 2"
    assert w1_hwio.shape == (3, 3, C, C) and w2_hwio.shape == (3, 3, C, C)
    HW = H * W
    B = _images_per_step(N, C, HW, jnp.dtype(x_nchw.dtype).itemsize)

    x = x_nchw.reshape(N, C, HW)  # NCHW -> (N, C, H*W): pure reshape, no transpose

    def prep_w(w):
        # HWIO (3,3,Cin,Cout) -> (Cout, 9*Cin) with column k*Cin + ci, k = kh*3+kw.
        return jnp.transpose(w.astype(jnp.float32).reshape(9, C, C),
                             (2, 0, 1)).reshape(C, 9 * C)

    out = pl.pallas_call(
        _make_kernel(B, C, H, W),
        out_shape=jax.ShapeDtypeStruct((N, C, HW), x_nchw.dtype),
        grid=(N // B,),
        in_specs=[
            pl.BlockSpec((B, C, HW), lambda n: (n, 0, 0)),
            pl.BlockSpec((C, 9 * C), lambda n: (0, 0)),
            pl.BlockSpec((C, 9 * C), lambda n: (0, 0)),
        ],
        out_specs=pl.BlockSpec((B, C, HW), lambda n: (n, 0, 0)),
        compiler_params=pltpu.CompilerParams(dimension_semantics=("parallel",)),
    )(x, prep_w(w1_hwio), prep_w(w2_hwio))
    return out.reshape(N, C, H, W)


def _reference_nchw(x, w1, b1, w2, b2):
    # pure-JAX reference (includes the biases, to verify the cancellation claim)
    xh = jnp.transpose(x, (0, 2, 3, 1))  # NHWC

    def block(h, w, b):
        hp = jnp.pad(h, ((0, 0), (1, 1), (1, 1), (0, 0)), mode="reflect")
        y = lax.conv_general_dilated(
            hp, w, (1, 1), "VALID",
            dimension_numbers=("NHWC", "HWIO", "NHWC")) + b
        mean = jnp.mean(y, axis=(1, 2), keepdims=True)
        var = jnp.var(y, axis=(1, 2), keepdims=True)
        return (y - mean) * lax.rsqrt(var + _EPS)

    h = jax.nn.relu(block(xh, w1, b1))
    out = xh + block(h, w2, b2)
    return jnp.transpose(out, (0, 3, 1, 2))


if __name__ == "__main__":
    # ResidualBlock(in_channels=4, out_channels=4, norm='instance'); x: (2,4,16,16) NCHW
    N, C, H, W = 2, 4, 16, 16
    key = jax.random.PRNGKey(0)
    kx, kw1, kb1, kw2, kb2 = jax.random.split(key, 5)
    x_nchw = jax.random.normal(kx, (N, C, H, W), jnp.float32)
    w1 = 0.1 * jax.random.normal(kw1, (3, 3, C, C), jnp.float32)   # HWIO
    b1 = 0.1 * jax.random.normal(kb1, (C,), jnp.float32)
    w2 = 0.1 * jax.random.normal(kw2, (3, 3, C, C), jnp.float32)
    b2 = 0.1 * jax.random.normal(kb2, (C,), jnp.float32)

    out = jax.block_until_ready(residual_block(x_nchw, w1, b1, w2, b2))

    ref = _reference_nchw(x_nchw, w1, b1, w2, b2)
    assert out.shape == x_nchw.shape and out.dtype == x_nchw.dtype
    err = float(jnp.max(jnp.abs(out - ref)))
    assert jnp.allclose(out, ref, atol=1e-3, rtol=1e-3), err
    print("KERNEL_OK")
</pallas_src>

<mosaic_0001>
module attributes {stable_mosaic.version = 11 : i64} {
  func.func @kernel(%arg0: i32, %arg1: memref<1x4x256xf32, #tpu.memory_space<vmem>>, %arg2: memref<4x36xf32, #tpu.memory_space<vmem>>, %arg3: memref<4x36xf32, #tpu.memory_space<vmem>>, %arg4: memref<1x4x256xf32, #tpu.memory_space<vmem>>) attributes {dimension_semantics = [#tpu.dimension_semantics<parallel>], iteration_bounds = array<i64: 2>, scalar_prefetch = 0 : i64, scratch_operands = 0 : i64, tpu.core_type = #tpu.core_type<tc>, window_params = [{transform_indices = @transform_0, window_bounds = array<i64: 1, 4, 256>}, {pipeline_mode = #tpu.pipeline_mode<synchronous>, transform_indices = @transform_1, window_bounds = array<i64: 4, 36>}, {pipeline_mode = #tpu.pipeline_mode<synchronous>, transform_indices = @transform_2, window_bounds = array<i64: 4, 36>}, {transform_indices = @transform_3, window_bounds = array<i64: 1, 4, 256>}]} {
    %0 = tpu.iota {dimensions = array<i32: 1>} : vector<4x256xi32>
    %c16_i32 = arith.constant 16 : i32
    %c0_i32 = arith.constant 0 : i32
    %1 = arith.cmpi eq, %c16_i32, %c0_i32 : i32
    %c1_i32 = arith.constant 1 : i32
    %2 = arith.select %1, %c1_i32, %c16_i32 : i32
    %3 = vector.broadcast %2 : i32 to vector<4x256xi32>
    %4 = arith.remsi %0, %3 : vector<4x256xi32>
    %c0_i32_0 = arith.constant 0 : i32
    %5 = vector.broadcast %c0_i32_0 : i32 to vector<4x256xi32>
    %6 = arith.cmpi ne, %4, %5 : vector<4x256xi32>
    %c0_i32_1 = arith.constant 0 : i32
    %7 = vector.broadcast %c0_i32_1 : i32 to vector<4x256xi32>
    %8 = arith.cmpi slt, %4, %7 : vector<4x256xi32>
    %c0_i32_2 = arith.constant 0 : i32
    %9 = arith.cmpi slt, %2, %c0_i32_2 : i32
    %10 = vector.broadcast %9 : i1 to vector<4x256xi1>
    %11 = vector.broadcast %10 : vector<4x256xi1> to vector<4x256xi1>
    %12 = arith.xori %8, %11 : vector<4x256xi1>
    %13 = arith.andi %12, %6 : vector<4x256xi1>
    %14 = vector.broadcast %2 : i32 to vector<4x256xi32>
    %15 = arith.addi %4, %14 : vector<4x256xi32>
    %16 = arith.select %13, %15, %4 : vector<4x256xi1>, vector<4x256xi32>
    %c0_i32_3 = arith.constant 0 : i32
    %17 = vector.broadcast %c0_i32_3 : i32 to vector<4x256xi32>
    %18 = arith.cmpi eq, %16, %17 : vector<4x256xi32>
    %c15_i32 = arith.constant 15 : i32
    %19 = vector.broadcast %c15_i32 : i32 to vector<4x256xi32>
    %20 = arith.cmpi eq, %16, %19 : vector<4x256xi32>
    %c16_i32_4 = arith.constant 16 : i32
    %21 = vector.broadcast %c16_i32_4 : i32 to vector<4x256xi32>
    %22 = arith.cmpi slt, %0, %21 : vector<4x256xi32>
    %c240_i32 = arith.constant 240 : i32
    %23 = vector.broadcast %c240_i32 : i32 to vector<4x256xi32>
    %24 = arith.cmpi sge, %0, %23 : vector<4x256xi32>
    %c0 = arith.constant 0 : index
    %c0_5 = arith.constant 0 : index
    %25 = vector.load %arg2[%c0, %c0_5] : memref<4x36xf32, #tpu.memory_space<vmem>>, vector<4x36xf32>
    %c0_6 = arith.constant 0 : index
    %c0_7 = arith.constant 0 : index
    %26 = vector.load %arg3[%c0_6, %c0_7] : memref<4x36xf32, #tpu.memory_space<vmem>>, vector<4x36xf32>
    %c0_8 = arith.constant 0 : index
    %c0_9 = arith.constant 0 : index
    %c0_10 = arith.constant 0 : index
    %27 = vector.load %arg1[%c0_8, %c0_9, %c0_10] : memref<1x4x256xf32, #tpu.memory_space<vmem>>, vector<1x4x256xf32>
    %28 = vector.shape_cast %27 : vector<1x4x256xf32> to vector<4x256xf32>
    %c1_i32_11 = arith.constant 1 : i32
    %29 = tpu.dynamic_rotate %28 by %c1_i32_11 dim 1 : vector<4x256xf32>, i32 -> vector<4x256xf32>
    %c255_i32 = arith.constant 255 : i32
    %30 = tpu.dynamic_rotate %28 by %c255_i32 dim 1 : vector<4x256xf32>, i32 -> vector<4x256xf32>
    %31 = arith.select %18, %30, %29 : vector<4x256xi1>, vector<4x256xf32>
    %32 = arith.select %20, %29, %30 : vector<4x256xi1>, vector<4x256xf32>
    %c16_i32_12 = arith.constant 16 : i32
    %33 = tpu.dynamic_rotate %31 by %c16_i32_12 dim 1 : vector<4x256xf32>, i32 -> vector<4x256xf32>
    %c240_i32_13 = arith.constant 240 : i32
    %34 = tpu.dynamic_rotate %31 by %c240_i32_13 dim 1 : vector<4x256xf32>, i32 -> vector<4x256xf32>
    %35 = arith.select %22, %34, %33 : vector<4x256xi1>, vector<4x256xf32>
    %36 = arith.select %24, %33, %34 : vector<4x256xi1>, vector<4x256xf32>
    %c16_i32_14 = arith.constant 16 : i32
    %37 = tpu.dynamic_rotate %28 by %c16_i32_14 dim 1 : vector<4x256xf32>, i32 -> vector<4x256xf32>
    %c240_i32_15 = arith.constant 240 : i32
    %38 = tpu.dynamic_rotate %28 by %c240_i32_15 dim 1 : vector<4x256xf32>, i32 -> vector<4x256xf32>
    %39 = arith.select %22, %38, %37 : vector<4x256xi1>, vector<4x256xf32>
    %40 = arith.select %24, %37, %38 : vector<4x256xi1>, vector<4x256xf32>
    %c16_i32_16 = arith.constant 16 : i32
    %41 = tpu.dynamic_rotate %32 by %c16_i32_16 dim 1 : vector<4x256xf32>, i32 -> vector<4x256xf32>
    %c240_i32_17 = arith.constant 240 : i32
    %42 = tpu.dynamic_rotate %32 by %c240_i32_17 dim 1 : vector<4x256xf32>, i32 -> vector<4x256xf32>
    %43 = arith.select %22, %42, %41 : vector<4x256xi1>, vector<4x256xf32>
    %44 = arith.select %24, %41, %42 : vector<4x256xi1>, vector<4x256xf32>
    %45 = tpu.concatenate %35, %39, %43, %31, %28, %32, %36, %40, %44 in 0 : vector<4x256xf32>, vector<4x256xf32>, vector<4x256xf32>, vector<4x256xf32>, vector<4x256xf32>, vector<4x256xf32>, vector<4x256xf32>, vector<4x256xf32>, vector<4x256xf32> -> vector<36x256xf32>
    %cst = arith.constant dense<0.000000e+00> : vector<4x256xf32>
    %46 = tpu.matmul %25, %45, %cst {dimension_numbers = #tpu.dot_dimension_numbers<[1], [0], [0], [1], [0, 0, 1, 1], [], []>} : vector<4x36xf32>, vector<36x256xf32>, vector<4x256xf32> -> vector<4x256xf32>
    %cst_18 = arith.constant dense<0.000000e+00> : vector<4xf32>
    %47 = vector.multi_reduction <add>, %46, %cst_18 [1] : vector<4x256xf32> to vector<4xf32>
    %48 = vector.shape_cast %47 : vector<4xf32> to vector<4x1xf32>
    %cst_19 = arith.constant 2.560000e+02 : f32
    %49 = vector.broadcast %cst_19 : f32 to vector<4x1xf32>
    %50 = arith.divf %48, %49 : vector<4x1xf32>
    %51 = vector.broadcast %50 : vector<4x1xf32> to vector<4x256xf32>
    %52 = arith.subf %46, %51 : vector<4x256xf32>
    %53 = arith.mulf %52, %52 : vector<4x256xf32>
    %cst_20 = arith.constant dense<0.000000e+00> : vector<4xf32>
    %54 = vector.multi_reduction <add>, %53, %cst_20 [1] : vector<4x256xf32> to vector<4xf32>
    %55 = vector.shape_cast %54 : vector<4xf32> to vector<4x1xf32>
    %cst_21 = arith.constant 2.560000e+02 : f32
    %56 = vector.broadcast %cst_21 : f32 to vector<4x1xf32>
    %57 = arith.divf %55, %56 : vector<4x1xf32>
    %cst_22 = arith.constant 9.99999974E-6 : f32
    %58 = vector.broadcast %cst_22 : f32 to vector<4x1xf32>
    %59 = arith.addf %57, %58 : vector<4x1xf32>
    %60 = math.rsqrt %59 : vector<4x1xf32>
    %61 = vector.broadcast %60 : vector<4x1xf32> to vector<4x256xf32>
    %62 = arith.mulf %52, %61 : vector<4x256xf32>
    %cst_23 = arith.constant 0.000000e+00 : f32
    %63 = vector.broadcast %cst_23 : f32 to vector<4x256xf32>
    %64 = arith.maximumf %62, %63 : vector<4x256xf32>
    %c1_i32_24 = arith.constant 1 : i32
    %65 = tpu.dynamic_rotate %64 by %c1_i32_24 dim 1 : vector<4x256xf32>, i32 -> vector<4x256xf32>
    %c255_i32_25 = arith.constant 255 : i32
    %66 = tpu.dynamic_rotate %64 by %c255_i32_25 dim 1 : vector<4x256xf32>, i32 -> vector<4x256xf32>
    %67 = arith.select %18, %66, %65 : vector<4x256xi1>, vector<4x256xf32>
    %68 = arith.select %20, %65, %66 : vector<4x256xi1>, vector<4x256xf32>
    %c16_i32_26 = arith.constant 16 : i32
    %69 = tpu.dynamic_rotate %67 by %c16_i32_26 dim 1 : vector<4x256xf32>, i32 -> vector<4x256xf32>
    %c240_i32_27 = arith.constant 240 : i32
    %70 = tpu.dynamic_rotate %67 by %c240_i32_27 dim 1 : vector<4x256xf32>, i32 -> vector<4x256xf32>
    %71 = arith.select %22, %70, %69 : vector<4x256xi1>, vector<4x256xf32>
    %72 = arith.select %24, %69, %70 : vector<4x256xi1>, vector<4x256xf32>
    %c16_i32_28 = arith.constant 16 : i32
    %73 = tpu.dynamic_rotate %64 by %c16_i32_28 dim 1 : vector<4x256xf32>, i32 -> vector<4x256xf32>
    %c240_i32_29 = arith.constant 240 : i32
    %74 = tpu.dynamic_rotate %64 by %c240_i32_29 dim 1 : vector<4x256xf32>, i32 -> vector<4x256xf32>
    %75 = arith.select %22, %74, %73 : vector<4x256xi1>, vector<4x256xf32>
    %76 = arith.select %24, %73, %74 : vector<4x256xi1>, vector<4x256xf32>
    %c16_i32_30 = arith.constant 16 : i32
    %77 = tpu.dynamic_rotate %68 by %c16_i32_30 dim 1 : vector<4x256xf32>, i32 -> vector<4x256xf32>
    %c240_i32_31 = arith.constant 240 : i32
    %78 = tpu.dynamic_rotate %68 by %c240_i32_31 dim 1 : vector<4x256xf32>, i32 -> vector<4x256xf32>
    %79 = arith.select %22, %78, %77 : vector<4x256xi1>, vector<4x256xf32>
    %80 = arith.select %24, %77, %78 : vector<4x256xi1>, vector<4x256xf32>
    %81 = tpu.concatenate %71, %75, %79, %67, %64, %68, %72, %76, %80 in 0 : vector<4x256xf32>, vector<4x256xf32>, vector<4x256xf32>, vector<4x256xf32>, vector<4x256xf32>, vector<4x256xf32>, vector<4x256xf32>, vector<4x256xf32>, vector<4x256xf32> -> vector<36x256xf32>
    %cst_32 = arith.constant dense<0.000000e+00> : vector<4x256xf32>
    %82 = tpu.matmul %26, %81, %cst_32 {dimension_numbers = #tpu.dot_dimension_numbers<[1], [0], [0], [1], [0, 0, 1, 1], [], []>} : vector<4x36xf32>, vector<36x256xf32>, vector<4x256xf32> -> vector<4x256xf32>
    %cst_33 = arith.constant dense<0.000000e+00> : vector<4xf32>
    %83 = vector.multi_reduction <add>, %82, %cst_33 [1] : vector<4x256xf32> to vector<4xf32>
    %84 = vector.shape_cast %83 : vector<4xf32> to vector<4x1xf32>
    %cst_34 = arith.constant 2.560000e+02 : f32
    %85 = vector.broadcast %cst_34 : f32 to vector<4x1xf32>
    %86 = arith.divf %84, %85 : vector<4x1xf32>
    %87 = vector.broadcast %86 : vector<4x1xf32> to vector<4x256xf32>
    %88 = arith.subf %82, %87 : vector<4x256xf32>
    %89 = arith.mulf %88, %88 : vector<4x256xf32>
    %cst_35 = arith.constant dense<0.000000e+00> : vector<4xf32>
    %90 = vector.multi_reduction <add>, %89, %cst_35 [1] : vector<4x256xf32> to vector<4xf32>
    %91 = vector.shape_cast %90 : vector<4xf32> to vector<4x1xf32>
    %cst_36 = arith.constant 2.560000e+02 : f32
    %92 = vector.broadcast %cst_36 : f32 to vector<4x1xf32>
    %93 = arith.divf %91, %92 : vector<4x1xf32>
    %cst_37 = arith.constant 9.99999974E-6 : f32
    %94 = vector.broadcast %cst_37 : f32 to vector<4x1xf32>
    %95 = arith.addf %93, %94 : vector<4x1xf32>
    %96 = math.rsqrt %95 : vector<4x1xf32>
    %97 = vector.broadcast %96 : vector<4x1xf32> to vector<4x256xf32>
    %98 = arith.mulf %88, %97 : vector<4x256xf32>
    %99 = arith.addf %28, %98 : vector<4x256xf32>
    %c0_38 = arith.constant 0 : index
    %c0_39 = arith.constant 0 : index
    %c0_40 = arith.constant 0 : index
    %100 = vector.load %arg4[%c0_38, %c0_39, %c0_40] : memref<1x4x256xf32, #tpu.memory_space<vmem>>, vector<1x4x256xf32>
    %101 = vector.shape_cast %100 : vector<1x4x256xf32> to vector<4x256xf32>
    %102 = vector.shape_cast %99 : vector<4x256xf32> to vector<1x4x256xf32>
    tpu.vector_store %arg4[%c0_38, %c0_39, %c0_40], %102 {strides = array<i32>} : memref<1x4x256xf32, #tpu.memory_space<vmem>>, vector<1x4x256xf32>,
    return
  }
  func.func @transform_0(%arg0: i32) -> (i32, i32, i32) {
    %c0_i32 = arith.constant 0 : i32
    %c0_i32_0 = arith.constant 0 : i32
    %c0_i32_1 = arith.constant 0 : i32
    return %arg0, %c0_i32, %c0_i32_0 : i32, i32, i32
  }
  func.func @transform_1(%arg0: i32) -> (i32, i32) {
    %c0_i32 = arith.constant 0 : i32
    %c0_i32_0 = arith.constant 0 : i32
    %c0_i32_1 = arith.constant 0 : i32
    return %c0_i32, %c0_i32_0 : i32, i32
  }
  func.func @transform_2(%arg0: i32) -> (i32, i32) {
    %c0_i32 = arith.constant 0 : i32
    %c0_i32_0 = arith.constant 0 : i32
    %c0_i32_1 = arith.constant 0 : i32
    return %c0_i32, %c0_i32_0 : i32, i32
  }
  func.func @transform_3(%arg0: i32) -> (i32, i32, i32) {
    %c0_i32 = arith.constant 0 : i32
    %c0_i32_0 = arith.constant 0 : i32
    %c0_i32_1 = arith.constant 0 : i32
    return %arg0, %c0_i32, %c0_i32_0 : i32, i32, i32
  }
}

</mosaic_0001>

<bundles_post_ra>
// kernel: tpu_custom_call.1
= control target key start
LH: loop header
LB: loop body
LE: loop exit
PB: predicated region body
PF: predicated region fallthrough
CT: control target
= control target key end

     0   :  { %8 = vsyncpa [#allocation3], 0  ;;  %s1482_s0 = inlined_call_operand.hbm [shape: f32[2,4,256], index: 0, kind: input, shape index: {}]   ;;  %s1483_s1 = inlined_call_operand.hbm [shape: f32[4,36], index: 1, kind: input, shape index: {}]   ;;  %s1484_s2 = inlined_call_operand.vmem [shape: f32[4,36], index: 2, kind: input, shape index: {}]   ;;  %s1485_s3 = inlined_call_operand.hbm [shape: f32[2,4,256], index: 3, kind: output, shape index: {}]  }
   0x1   :  { %10 = vsyncpa [#allocation3 + $0x1], 0 }
   0x2   :  { %11 = vsyncpa [#allocation6], 0 }
   0x3   :  { %12 = vsyncpa [#allocation4], 0 }
   0x4   :  { %14 = vsyncpa [#allocation4 + $0x1], 0  ;;  %s1047_s12 = smov 0   ;;  %s1049_s13 = smov 0  }
   0x5   :  { %s1051_s14 = smov 0   ;;  %s1053_s15 = smov 0  }
   0x6 LB: > { %s1068_s16 = sadd.s32 4294967295, %s1017_s15   ;;  %s742_s17 = sadd.s32 4294967294, %s1017_s15   ;;  %s1017_s15 = sphi %s1053_s15, %s1517_s15   ;;  %s1013_s14 = sphi %s1051_s14, %s1516_s14   ;;  %s1009_s13 = sphi %s1049_s13, %s1515_s13   ;;  %s1005_s12 = sphi %s1047_s12, %s1514_s12  }
   0x7   : > { %p40_p0 = scmp.ne.s32.totalorder %s1009_s13, %s1005_s12  ;;  %p1486_p1 = scmp.eq.s32.totalorder %s1068_s16, 0 }
   0x8   : > { %p112_p3 = scmp.eq.s32.totalorder %s742_s17, 1  ;;  %p743_p5 = scmp.ge.s32.totalorder %s1017_s15, 1 }
   0x9   : > { %p1077_p4 = por %p1486_p1, %p40_p0  ;;  %p119_p7 = scmp.lt.s32.totalorder %s1017_s15, 3 }
   0xa   : > { %p1082_p6 = por %p112_p3, %p40_p0  ;;  %s1019_s21 = smov [#allocation5]  }
   0xb   : > { %s1489_s18 = scalar_select %p1077_p4, 1, 0 }
   0xc   : > { %s1490_s19 = scalar_select %p1082_p6, 1, 0 }
   0xd   : > { %p1087_p8 = pnand %p743_p5, %p119_p7  ;;  %s132_s22 = sshll.u32 %s1019_s21, 4  ;;  %s133_s22 = int_to_ptr.vmem [resolvable:$true] %s132_s22 }
   0xe   : > { %s1095_s23 = sadd.s32 1, %s1017_s15   ;;  %s27_s27 = sadd.s32 1, %s1013_s14 }
   0xf   : > { %s1491_s20 = scalar_select %p1087_p8, 1, 0 }
  0x10   : > { %p790_p10 = pneg %p1087_p8  ;;  %s24_s25 = ssub.s32 %s1017_s15, %s1095_s23 }
  0x11   : > { %p1105_p12 = scmp.eq.s32.totalorder %s24_s25, 0  ;;  %s889_s30 = scalar_lea.hbm %s1483_s1, 64 }
  0x12   : > { %p1099_p11 = pnand %p790_p10, %p1486_p1  ;;  %p890_p0 = scmp.ne.s32.totalorder %s1483_s1, %s889_s30 }
  0x13   : > { %s1493_s26 = scalar_select %p1105_p12, 1, 0 }
  0x14   : > { %p891_p3 = pneg %p1099_p11  ;;  %p896_p10 = scmp.lt.u32.totalorder %s889_s30, %s1483_s1 }
  0x16   : > { %p892_p5 = pnand %p891_p3, %p890_p0 }
  0x18   : > { %p893_p7 = pneg %p892_p5 }
  0x1a   : > { %p898_p9 = pnand %p896_p10, %p893_p7 }
  0x1c   : > { %901 = shalt.err (!%p898_p9)
}
  0x1d   : > { %s902_s8 = scalar_lea.vmem %s133_s22, 64  ;;  %p910_p6 = scmp.lt.s32.totalorder %s133_s22, %s133_s22 }
  0x1e   : > { %p903_p1 = scmp.ne.s32.totalorder %s133_s22, %s902_s8  ;;  %p911_p4 = scmp.lt.s32.totalorder %s902_s8, %s902_s8 }
  0x20   : > { %p905_p2 = pnand %p903_p1, %p891_p3  ;;  %p912_p8 = por %p911_p4, %p910_p6 }
  0x22   : > { %p906_p13 = pneg %p905_p2 }
  0x24   : > { %p913_p12 = pnand %p912_p8, %p906_p13 }
  0x26   : > { %916 = shalt.err (!%p913_p12)
}
  0x27   : > { %793 = dma.hbm_to_vmem [thread:$0]  (!%p1099_p11), %s1483_s1, 64, %s133_s22, [#allocation6]  }
  0x28   : > { %p1494_p1 = scmp.ne.s32.totalorder %s1493_s26, 0  ;;  %p35_p2 = scmp.eq.s32.totalorder %s1017_s15, 0 }
  0x29   : > { %p1495_p4 = scmp.ne.s32.totalorder %s1013_s14, %s1009_s13  ;;  %p1496_p6 = scmp.eq.s32.totalorder %s1068_s16, 1 }
  0x2a   : > { %s1131_s11 = scalar_select %p1494_p1, %s1013_s14, %s27_s27  }
  0x2b   : > { %p1139_p8 = por %p1496_p6, %p1495_p4  ;;  %p803_p9 = scmp.lt.s32.totalorder %s1017_s15, 2 }
  0x2c   : > { %s146_s21 = sand.u32 1, %s1013_s14   ;;  %p1498_p12 = pmov %p1495_p4 }
  0x2d   : > { %s746_s24 = sshll.u32 %s146_s21, 3  ;;  %s764_s25 = sshll.u32 %s1017_s15, 7 }
  0x2e   : > { %p36_p13 = por %p35_p2, %p1498_p12  ;;  %s1152_s22 = scalar_lea.hbm %s1482_s0, %s764_s25 }
  0x2f   : > { %s150_s26 = scalar_lea.vmem [#allocation2], %s746_s24  ;;  %s147_s4 = scalar_lea.sflag [#allocation3], %s146_s21 }
  0x30   : > { %s158_s27 = sshll.u32 %s150_s26, 4  ;;  %p1154_p11 = pnand %p803_p9, %p36_p13  ;;  %s1158_s27 = int_to_ptr.vmem [resolvable:$true] %s158_s27 }
  0x31   : > { %s917_s5 = scalar_lea.hbm %s1152_s22, 128  ;;  %s922_s8 = scalar_lea.hbm %s1482_s0, 256 }
  0x32   : > { %p918_p0 = scmp.ne.s32.totalorder %s1152_s22, %s917_s5  ;;  %p919_p3 = pneg %p1154_p11 }
  0x33   : > { %p923_p10 = scmp.lt.u32.totalorder %s1152_s22, %s1482_s0  ;;  %p924_p1 = scmp.lt.u32.totalorder %s922_s8, %s917_s5 }
  0x34   : > { %p920_p5 = pnand %p919_p3, %p918_p0  ;;  %p926_p4 = scmp.lt.u32.totalorder %s917_s5, %s1152_s22 }
  0x35   : > { %p925_p2 = por %p924_p1, %p923_p10 }
  0x36   : > { %p921_p7 = pneg %p920_p5 }
  0x37   : > { %p927_p6 = por %p926_p4, %p925_p2 }
  0x39   : > { %p928_p9 = pnand %p927_p6, %p921_p7 }
  0x3b   : > { %931 = shalt.err (!%p928_p9)
}
  0x3c   : > { %s932_s21 = scalar_lea.vmem %s1158_s27, 128  ;;  %s1020_s24 = smov [#allocation2]  }
  0x3d   : > { %p933_p12 = scmp.ne.s32.totalorder %s1158_s27, %s932_s21  ;;  %s937_s25 = sshll.u32 %s1020_s24, 4  ;;  %s938_s25 = int_to_ptr.vmem [resolvable:$false] %s937_s25 }
  0x3e   : > { %s939_s28 = scalar_lea.vmem %s938_s25, 256  ;;  %p940_p5 = scmp.lt.s32.totalorder %s1158_s27, %s938_s25 }
  0x3f   : > { %p935_p13 = pnand %p933_p12, %p919_p3  ;;  %p941_p10 = scmp.lt.s32.totalorder %s939_s28, %s932_s21 }
  0x41   : > { %p936_p0 = pneg %p935_p13  ;;  %p942_p1 = por %p941_p10, %p940_p5 }
  0x43   : > { %p943_p2 = pnand %p942_p1, %p936_p0 }
  0x45   : > { %946 = shalt.err (!%p943_p2)
}
  0x46   : > { %797 = dma.hbm_to_vmem [thread:$0]  (!%p1154_p11), %s1152_s22, 128, %s1158_s27, %s147_s4  }
  0x47   : > { %p1500_p7 = scmp.ne.s32.totalorder %s1491_s20, 0 }
  0x48   : > { %s1188_s29 = sand.u32 (!%p1500_p7), 1, %s1009_s13   ;;  %p1501_p3 = scmp.ne.s32.totalorder (!%p1500_p7), %s1489_s18, 0 }
  0x49   : > { %167 = sbr.rel (%p1500_p7) target bundleno = 1677 (0x68d), region = 32  ;;  %s750_s26 = sshll.u32 (!%p1500_p7), %s1188_s29, 3 }
  0x4a   : > { %s170_s5 = scalar_lea.sflag (!%p1500_p7), [#allocation3], %s1188_s29  ;;  %s173_s6 = scalar_lea.vmem (!%p1500_p7), [#allocation2], %s750_s26 }
  0x50   : > { %992 = dma.done.wait (%p1501_p3), %s170_s5, 128  }
  0x51   : > { %994 = vsyncadd (%p1501_p3), %s170_s5, 4294967168  ;;  %p1502_p11 = scmp.eq.s32.totalorder %s1068_s16, 0 }
  0x53   : > { %996 = dma.done.wait (%p1502_p11), [#allocation6], 64   ;;  %p1503_p4 = pmov %p1502_p11 }
  0x54   : > { %v1202_v0 = vld [vmem:[%s173_s6] sm:$0xff]  ;;  %s1021_s20 = smov 127   ;;  %s1022_s22 = smov 1   ;;  %v200_v3 = vlaneseq  ;;  %v1025_v25 = vmov 0.0   ;;  %vm332_vm9 = vcmask 1043456   ;;  %vm341_vm10 = vcmask 293888  }
  0x55   : > { %998 = vsyncadd (%p1503_p4), [#allocation6], 4294967232  ;;  %248 = vrot.lane.b32.xlu1 %v1202_v0, %s1021_s20  ;;  %241 = vrot.lane.b32.xlu0 %v1202_v0, %s1022_s22  ;;  %v1210_v1 = vcombine.high %v1202_v0, %v1202_v0  ;;  %s1023_s18 = smov 112   ;;  %s1024_s27 = smov 16  }
  0x56   : > { %v1220_v4 = vand.u32 127, %v200_v3  ;;  %415 = vmatprep.mubr.f32.mxu0 %v1025_v25  ;;  %614 = vmatprep.mubr.f32.mxu1 %v1025_v25  ;;  %s765_s7 = sshll.u32 %s1068_s16, 7  ;;  %s199_s8 = scalar_lea.vmem [#allocation7], %s750_s26 }
  0x57   : > { %v849_v2 = vpack.i.bf16 %v1210_v1, %v1202_v0  ;;  %s662_s9 = sshll.u32 %s199_s8, 4  ;;  %s1438_s24 = scalar_lea.hbm %s1485_s3, %s765_s7  ;;  %s1440_s9 = int_to_ptr.vmem [resolvable:$true] %s662_s9 }
  0x58   : > { %v1223_v5 = vadd.s32 128, %v1220_v4  ;;  %v207_v6 = vand.u32 15, %v1220_v4  ;;  %vm252_vm0 = vcmp.lt.s32.totalorder %v1220_v4, 127  ;;  %vm245_vm1 = vcmp.lt.s32.totalorder %v1220_v4, 1  ;;  %s648_s25 = scalar_lea.sflag [#allocation4], %s1188_s29  ;;  %s947_s28 = scalar_lea.vmem %s1440_s9, 128 }
  0x59   : > { %250 = vrot.lane.b32.xlu1 %v1210_v1, %s1021_s20  ;;  %243 = vrot.lane.b32.xlu0 %v1210_v1, %s1022_s22  ;;  %vm231_vm6 = vcmp.lt.s32.totalorder %v1220_v4, 16  ;;  %vm269_vm7 = vcmp.lt.s32.totalorder %v1220_v4, 112  ;;  %p948_p6 = scmp.ne.s32.totalorder %s1440_s9, %s947_s28  ;;  %s1026_s16 = smov [#allocation7]  }
  0x5a   : > { %v214_v7 = vand.u32 15, %v1223_v5  ;;  %vm1229_vm2 = vcmp.eq.s32.totalorder %v207_v6, 0  ;;  %vm1258_vm5 = vcmp.eq.s32.totalorder %v207_v6, 15  ;;  %vm234_vm8 = vcmp.ge.s32.totalorder %v1223_v5, 240  ;;  %s951_s26 = sshll.u32 %s1026_s16, 4  ;;  %s952_s26 = int_to_ptr.vmem [resolvable:$false] %s951_s26 }
  0x5b   : > { %p949_p9 = pnand %p948_p6, %p1139_p8  ;;  %s953_s5 = scalar_lea.vmem %s952_s26, 256 }
  0x5c   : > { %vm1233_vm3 = vcmp.eq.s32.totalorder %v214_v7, 0  ;;  %vm1254_vm4 = vcmp.eq.s32.totalorder %v214_v7, 15  ;;  %p954_p13 = scmp.lt.s32.totalorder %s1440_s9, %s952_s26  ;;  %p955_p0 = scmp.lt.s32.totalorder %s953_s5, %s947_s28 }
  0x5d   : > { %850 = vrot.lane.b32.xlu1 %v849_v2, %s1023_s18  ;;  %845 = vrot.lane.b32.xlu0 %v849_v2, %s1024_s27  ;;  %p950_p12 = pneg %p949_p9 }
  0x5e   : > { %p956_p5 = por %p955_p0, %p954_p13 }
  0x60   : > { %p957_p10 = pnand %p956_p5, %p950_p12 }
  0xc7   : > { %v249_v8 = vpop.permute.xlu1 %248  ;;  %v242_v9 = vpop.permute.xlu0 %241 }
  0xcb   : > { %v251_v12 = vpop.permute.xlu1 %250  ;;  %v244_v13 = vpop.permute.xlu0 %243 }
  0xcc   : > { %v253_v14 = vsel %vm252_vm0, %v249_v8, %v251_v12  ;;  %v254_v15 = vsel %vm252_vm0, %v251_v12, %v249_v8  ;;  %v246_v16 = vsel %vm245_vm1, %v242_v9, %v244_v13  ;;  %v247_v17 = vsel %vm245_vm1, %v244_v13, %v242_v9 }
  0xcd   : > { %v1247_v18 = vsel %vm1229_vm2, %v253_v14, %v247_v17  ;;  %v256_v19 = vsel %vm1233_vm3, %v254_v15, %v246_v16  ;;  %v1264_v23 = vsel %vm1254_vm4, %v246_v16, %v254_v15  ;;  %v1268_v24 = vsel %vm1258_vm5, %v247_v17, %v253_v14 }
  0xce   : > { %v859_v20 = vpack.i.bf16 %v256_v19, %v1247_v18  ;;  %v317_v47 = vrot.slane %v256_v19, 4  ;;  %v323_v57 = vrot.slane %v1264_v23, 4  ;;  %v316_v62 = vrot.slane %v1247_v18, 4 }
  0xcf   : > { %v846_v26 = vpop.permute.xlu0 %845  ;;  %v851_v27 = vpop.permute.xlu1 %850  ;;  %v322_v8 = vrot.slane %v1268_v24, 4 }
  0xd0   : > { %860 = vrot.lane.b32.xlu1 %v859_v20, %s1023_s18  ;;  %855 = vrot.lane.b32.xlu0 %v859_v20, %s1024_s27  ;;  %v848_v28 = vunpack.i.h.bf16 %v846_v26  ;;  %v847_v29 = vunpack.i.l.bf16 %v846_v26  ;;  %v853_v30 = vunpack.i.h.bf16 %v851_v27  ;;  %v852_v31 = vunpack.i.l.bf16 %v851_v27 }
  0xd1   : > { %v338_v15 = vsel %vm332_vm9, %v1210_v1, %v323_v57  ;;  %v337_v19 = vsel %vm332_vm9, %v1202_v0, %v322_v8 }
  0xd2   : > { %v280_v32 = vsel %vm231_vm6, %v847_v29, %v848_v28  ;;  %v287_v39 = vsel %vm269_vm7, %v853_v30, %v852_v31  ;;  %v286_v40 = vsel %vm269_vm7, %v852_v31, %v853_v30  ;;  %v281_v41 = vsel %vm231_vm6, %v848_v28, %v847_v29 }
  0xd3   : > { %v311_v46 = vrot.slane %v280_v32, 4  ;;  %v291_v48 = vsel %vm234_vm8, %v280_v32, %v287_v39  ;;  %v288_v54 = vsel %vm231_vm6, %v286_v40, %v281_v41  ;;  %v328_v9 = vrot.slane %v286_v40, 4 }
  0xd4   : > { %294 = vrot.lane.b32.xlu1 %v1264_v23, %s1024_s27  ;;  %292 = vrot.lane.b32.xlu0 %v1268_v24, %s1024_s27  ;;  %v329_v58 = vrot.slane %v291_v48, 4  ;;  %v310_v3 = vrot.slane %v288_v54, 4 }
  0xd8   : > { %300 = vrot.lane.b32.xlu1 %v1264_v23, %s1023_s18  ;;  %298 = vrot.lane.b32.xlu0 %v1268_v24, %s1023_s18  ;;  %v235_v24 = vld [vmem:[#allocation5] sm:$0xf] }
 0x142   : > { %v861_v33 = vpop.permute.xlu1 %860  ;;  %v856_v34 = vpop.permute.xlu0 %855 }
 0x143   : > { %v863_v35 = vunpack.i.h.bf16 %v861_v33  ;;  %v862_v36 = vunpack.i.l.bf16 %v861_v33  ;;  %v858_v37 = vunpack.i.h.bf16 %v856_v34  ;;  %v857_v38 = vunpack.i.l.bf16 %v856_v34 }
 0x145   : > { %v263_v42 = vsel %vm231_vm6, %v857_v38, %v858_v37  ;;  %v271_v43 = vsel %vm269_vm7, %v863_v35, %v862_v36  ;;  %v270_v49 = vsel %vm269_vm7, %v862_v36, %v863_v35  ;;  %v264_v50 = vsel %vm231_vm6, %v858_v37, %v857_v38 }
 0x146   : > { %v295_v44 = vpop.permute.xlu1 %294  ;;  %v293_v45 = vpop.permute.xlu0 %292  ;;  %v334_v52 = vsel %vm332_vm9, %v263_v42, %v311_v46  ;;  %v275_v55 = vsel %vm234_vm8, %v263_v42, %v271_v43  ;;  %v272_v61 = vsel %vm231_vm6, %v270_v49, %v264_v50  ;;  %v339_v17 = vsel %vm332_vm9, %v270_v49, %v328_v9 }
 0x147   : > { %v296_v51 = vsel %vm231_vm6, %v293_v45, %v295_v44  ;;  %v297_v63 = vsel %vm231_vm6, %v295_v44, %v293_v45  ;;  %v340_v7 = vsel %vm332_vm9, %v275_v55, %v329_v58  ;;  %v333_v12 = vsel %vm332_vm9, %v272_v61, %v310_v3 }
 0x148   : > { %v336_v53 = vsel %vm332_vm9, %v296_v51, %v317_v47  ;;  %v770_v16 = vpack.c.bf16 %v340_v7, %v338_v15  ;;  %v772_v20 = vpack.c.bf16 %v339_v17, %v337_v19 }
 0x149   : > { %v766_v56 = vpack.c.bf16 %v336_v53, %v334_v52 }
 0x14a   : > { %v301_v59 = vpop.permute.xlu1 %300  ;;  %v299_v60 = vpop.permute.xlu0 %298 }
 0x14b   : > { %v302_v2 = vsel %vm269_vm7, %v299_v60, %v301_v59  ;;  %767 = vmatprep.subr.bf16.mxu0 %v766_v56  ;;  %v303_v18 = vsel %vm269_vm7, %v301_v59, %v299_v60 }
 0x14c   : > { %v304_v6 = vsel %vm231_vm6, %v302_v2, %v297_v63  ;;  %v307_v23 = vsel %vm234_vm8, %v296_v51, %v303_v18 }
 0x14d   : > { %v335_v13 = vsel %vm332_vm9, %v304_v6, %v316_v62 }
 0x14e   : > { %v768_v14 = vpack.c.bf16 %v335_v13, %v333_v12 }
 0x150   : > { %769 = vmatpush1.bf16.msra.mxu0 %v768_v14 }
 0x151   : > { %771 = vmatprep.subr.bf16.mxu0 %v770_v16 }
 0x154   : > { %773 = vmatpush1.bf16.msra.mxu0 %v772_v20 }
 0x155   : > { %753 = vmatprep.subr.msk.mxu0 %vm332_vm9, %v307_v23 }
 0x158   : > { %754 = vmatpush1.msk.msra.mxu0 %vm332_vm9, %v302_v2 }
 0x159   : > { %755 = vmatmul.mubr.msk.f32.vlgmr.msra.gmra.mrb[0].mxu0 %vm341_vm10, %v235_v24 }
 0x22c   : > { %v417_v1 = vpop.f32.mrb[0].mxu0 }
 0x22d   : > { %v422_v25 = vsel %vm332_vm9, %v417_v1, 0.0  ;;  %v419_v26 = vpop.f32.mrb[1].mxu0 }
 0x22e   : > { %v423_v27 = vsel %vm332_vm9, %v419_v26, 0.0 }
 0x22f   : > { %v424_v28 = vadd.f32 %v423_v27, %v422_v25 }
 0x231   : > { %425 = vadd.xlane.f32.xlu0 %v424_v28 }
 0x2be   : > { %v426_v29 = vpop.xlane.xlu0 %425 }
 0x2bf   : > { %v428_v30 = vmul.f32 0.00390625, %v426_v29 }
 0x2c1   : > { %v429_v31 = vsub.f32 %v417_v1, %v428_v30  ;;  %v430_v32 = vsub.f32 %v419_v26, %v428_v30 }
 0x2c3   : > { %v431_v33 = vmul.f32 %v429_v31, %v429_v31  ;;  %v432_v34 = vmul.f32 %v430_v32, %v430_v32 }
 0x2c5   : > { %v433_v35 = vsel %vm332_vm9, %v431_v33, 0.0  ;;  %v434_v36 = vsel %vm332_vm9, %v432_v34, 0.0 }
 0x2c6   : > { %v435_v37 = vadd.f32 %v434_v36, %v433_v35 }
 0x2c8   : > { %436 = vadd.xlane.f32.xlu1 %v435_v37 }
 0x355   : > { %v437_v38 = vpop.xlane.xlu1 %436 }
 0x356   : > { %v438_v39 = vmul.f32 0.00390625, %v437_v38 }
 0x358   : > { %v439_v40 = vadd.f32 1e-05, %v438_v39 }
 0x35a   : > { %885 = vrsqrt.f32 %v439_v40 }
 0x364   : > { %v886_v41 = vpop.eup %885 }
 0x365   : > { %v442_v42 = vmul.f32 %v886_v41, %v430_v32  ;;  %v441_v43 = vmul.f32 %v886_v41, %v429_v31 }
 0x367   : > { %v1337_v44 = vmax.f32 %v442_v42, 0.0  ;;  %v1339_v45 = vmax.f32 %v441_v43, 0.0 }
 0x369   : > { %447 = vrot.lane.b32.xlu1 %v1337_v44, %s1022_s22  ;;  %445 = vrot.lane.b32.xlu0 %v1339_v45, %s1022_s22  ;;  %v869_v46 = vpack.i.bf16 %v1337_v44, %v1339_v45 }
 0x36d   : > { %453 = vrot.lane.b32.xlu1 %v1337_v44, %s1021_s20  ;;  %451 = vrot.lane.b32.xlu0 %v1339_v45, %s1021_s20 }
 0x371   : > { %870 = vrot.lane.b32.xlu1 %v869_v46, %s1023_s18  ;;  %865 = vrot.lane.b32.xlu0 %v869_v46, %s1024_s27 }
 0x3db   : > { %v448_v47 = vpop.permute.xlu1 %447  ;;  %v446_v48 = vpop.permute.xlu0 %445 }
 0x3dc   : > { %v449_v51 = vsel %vm245_vm1, %v446_v48, %v448_v47  ;;  %v450_v52 = vsel %vm245_vm1, %v448_v47, %v446_v48 }
 0x3df   : > { %v454_v49 = vpop.permute.xlu1 %453  ;;  %v452_v50 = vpop.permute.xlu0 %451 }
 0x3e0   : > { %v455_v53 = vsel %vm252_vm0, %v452_v50, %v454_v49  ;;  %v456_v54 = vsel %vm252_vm0, %v454_v49, %v452_v50 }
 0x3e1   : > { %v457_v55 = vsel %vm1229_vm2, %v455_v53, %v450_v52  ;;  %v458_v56 = vsel %vm1233_vm3, %v456_v54, %v449_v51  ;;  %v460_v58 = vsel %vm1254_vm4, %v449_v51, %v456_v54  ;;  %v459_v59 = vsel %vm1258_vm5, %v450_v52, %v455_v53 }
 0x3e2   : > { %v879_v57 = vpack.i.bf16 %v458_v56, %v457_v55  ;;  %v518_v19 = vrot.slane %v458_v56, 4  ;;  %v524_v31 = vrot.slane %v460_v58, 4  ;;  %v517_v35 = vrot.slane %v457_v55, 4 }
 0x3e3   : > { %v866_v10 = vpop.permute.xlu0 %865  ;;  %v871_v11 = vpop.permute.xlu1 %870  ;;  %v523_v42 = vrot.slane %v459_v59, 4 }
 0x3e4   : > { %880 = vrot.lane.b32.xlu1 %v879_v57, %s1023_s18  ;;  %875 = vrot.lane.b32.xlu0 %v879_v57, %s1024_s27  ;;  %v868_v60 = vunpack.i.h.bf16 %v866_v10  ;;  %v867_v61 = vunpack.i.l.bf16 %v866_v10  ;;  %v873_v62 = vunpack.i.h.bf16 %v871_v11  ;;  %v872_v63 = vunpack.i.l.bf16 %v871_v11 }
 0x3e5   : > { %v538_v48 = vsel %vm332_vm9, %v1337_v44, %v524_v31  ;;  %v537_v52 = vsel %vm332_vm9, %v1339_v45, %v523_v42  ;;  %v236_v44 = vld [vmem:[%s1484_s2] sm:$0xf] }
 0x3e6   : > { %v481_v21 = vsel %vm231_vm6, %v867_v61, %v868_v60  ;;  %v488_v9 = vsel %vm269_vm7, %v873_v62, %v872_v63  ;;  %v487_v12 = vsel %vm269_vm7, %v872_v63, %v873_v62  ;;  %v482_v13 = vsel %vm231_vm6, %v868_v60, %v867_v61 }
 0x3e7   : > { %v512_v18 = vrot.slane %v481_v21, 4  ;;  %v492_v20 = vsel %vm234_vm8, %v481_v21, %v488_v9  ;;  %v489_v27 = vsel %vm231_vm6, %v487_v12, %v482_v13  ;;  %v529_v41 = vrot.slane %v487_v12, 4 }
 0x3e8   : > { %495 = vrot.lane.b32.xlu1 %v460_v58, %s1024_s27  ;;  %493 = vrot.lane.b32.xlu0 %v459_v59, %s1024_s27  ;;  %v530_v30 = vrot.slane %v492_v20, 4  ;;  %v511_v38 = vrot.slane %v489_v27, 4 }
 0x3ec   : > { %501 = vrot.lane.b32.xlu1 %v460_v58, %s1023_s18  ;;  %499 = vrot.lane.b32.xlu0 %v459_v59, %s1023_s18 }
 0x456   : > { %v881_v2 = vpop.permute.xlu1 %880  ;;  %v876_v22 = vpop.permute.xlu0 %875 }
 0x457   : > { %v883_v3 = vunpack.i.h.bf16 %v881_v2  ;;  %v882_v6 = vunpack.i.l.bf16 %v881_v2  ;;  %v878_v7 = vunpack.i.h.bf16 %v876_v22  ;;  %v877_v8 = vunpack.i.l.bf16 %v876_v22 }
 0x459   : > { %v465_v14 = vsel %vm231_vm6, %v877_v8, %v878_v7  ;;  %v472_v15 = vsel %vm269_vm7, %v883_v3, %v882_v6  ;;  %v471_v23 = vsel %vm269_vm7, %v882_v6, %v883_v3  ;;  %v466_v24 = vsel %vm231_vm6, %v878_v7, %v877_v8 }
 0x45a   : > { %v496_v16 = vpop.permute.xlu1 %495  ;;  %v494_v17 = vpop.permute.xlu0 %493  ;;  %v534_v25 = vsel %vm332_vm9, %v465_v14, %v512_v18  ;;  %v476_v28 = vsel %vm234_vm8, %v465_v14, %v472_v15  ;;  %v473_v34 = vsel %vm231_vm6, %v471_v23, %v466_v24  ;;  %v539_v50 = vsel %vm332_vm9, %v471_v23, %v529_v41 }
 0x45b   : > { %v497_v1 = vsel %vm231_vm6, %v494_v17, %v496_v16  ;;  %v498_v36 = vsel %vm231_vm6, %v496_v16, %v494_v17  ;;  %v540_v40 = vsel %vm332_vm9, %v476_v28, %v530_v30  ;;  %v533_v43 = vsel %vm332_vm9, %v473_v34, %v511_v38 }
 0x45c   : > { %v536_v26 = vsel %vm332_vm9, %v497_v1, %v518_v19  ;;  %v778_v49 = vpack.c.bf16 %v540_v40, %v538_v48  ;;  %v780_v53 = vpack.c.bf16 %v539_v50, %v537_v52 }
 0x45d   : > { %v774_v29 = vpack.c.bf16 %v536_v26, %v534_v25 }
 0x45e   : > { %v502_v32 = vpop.permute.xlu1 %501  ;;  %v500_v33 = vpop.permute.xlu0 %499 }
 0x45f   : > { %v503_v37 = vsel %vm269_vm7, %v500_v33, %v502_v32  ;;  %775 = vmatprep.subr.bf16.mxu1 %v774_v29  ;;  %v504_v51 = vsel %vm269_vm7, %v502_v32, %v500_v33 }
 0x460   : > { %v505_v39 = vsel %vm231_vm6, %v503_v37, %v498_v36  ;;  %v508_v54 = vsel %vm234_vm8, %v497_v1, %v504_v51 }
 0x461   : > { %v535_v46 = vsel %vm332_vm9, %v505_v39, %v517_v35 }
 0x462   : > { %v776_v47 = vpack.c.bf16 %v535_v46, %v533_v43 }
 0x464   : > { %777 = vmatpush1.bf16.msra.mxu1 %v776_v47 }
 0x465   : > { %779 = vmatprep.subr.bf16.mxu1 %v778_v49 }
 0x468   : > { %781 = vmatpush1.bf16.msra.mxu1 %v780_v53 }
 0x469   : > { %756 = vmatprep.subr.msk.mxu1 %vm332_vm9, %v508_v54 }
 0x46c   : > { %757 = vmatpush1.msk.msra.mxu1 %vm332_vm9, %v503_v37 }
 0x46d   : > { %758 = vmatmul.mubr.msk.f32.vlgmr.msra.gmra.mrb[0].mxu1 %vm341_vm10, %v236_v44 }
 0x540   : > { %v616_v4 = vpop.f32.mrb[0].mxu1 }
 0x541   : > { %v621_v55 = vsel %vm332_vm9, %v616_v4, 0.0  ;;  %v618_v56 = vpop.f32.mrb[1].mxu1 }
 0x542   : > { %v622_v45 = vsel %vm332_vm9, %v618_v56, 0.0 }
 0x543   : > { %v623_v57 = vadd.f32 %v622_v45, %v621_v55 }
 0x545   : > { %624 = vadd.xlane.f32.xlu0 %v623_v57 }
 0x5d2   : > { %v625_v5 = vpop.xlane.xlu0 %624 }
 0x5d3   : > { %v626_v58 = vmul.f32 0.00390625, %v625_v5 }
 0x5d5   : > { %v627_v59 = vsub.f32 %v616_v4, %v626_v58  ;;  %v628_v10 = vsub.f32 %v618_v56, %v626_v58 }
 0x5d7   : > { %v629_v11 = vmul.f32 %v627_v59, %v627_v59  ;;  %v630_v60 = vmul.f32 %v628_v10, %v628_v10 }
 0x5d9   : > { %v631_v61 = vsel %vm332_vm9, %v629_v11, 0.0  ;;  %v632_v62 = vsel %vm332_vm9, %v630_v60, 0.0 }
 0x5da   : > { %v633_v63 = vadd.f32 %v632_v62, %v631_v61 }
 0x5dc   : > { %634 = vadd.xlane.f32.xlu1 %v633_v63 }
 0x669   : > { %v635_v21 = vpop.xlane.xlu1 %634 }
 0x66a   : > { %v636_v2 = vmul.f32 0.00390625, %v635_v21 }
 0x66c   : > { %v637_v22 = vadd.f32 1e-05, %v636_v2 }
 0x66e   : > { %887 = vrsqrt.f32 %v637_v22 }
 0x678   : > { %v888_v3 = vpop.eup %887 }
 0x679   : > { %v639_v6 = vmul.f32 %v888_v3, %v627_v59  ;;  %v640_v7 = vmul.f32 %v888_v3, %v628_v10 }
 0x67b   : > { %v643_v8 = vcombine.low %v639_v6, %v640_v7 }
 0x67d   : > { %v645_v9 = vadd.f32 %v643_v8, %v1202_v0 }
 0x67f   : > { %646 = vst [vmem:[%s199_s8] sm:$0xff] %v645_v9 }
 0x680   : > { %960 = shalt.err (!%p957_p10)
}
 0x681   : > { %s961_s29 = scalar_lea.hbm %s1438_s24, 128  ;;  %s965_s22 = scalar_lea.hbm %s1485_s3, 256 }
 0x682   : > { %p962_p1 = scmp.ne.s32.totalorder %s1438_s24, %s961_s29  ;;  %p966_p3 = scmp.lt.u32.totalorder %s1438_s24, %s1485_s3 }
 0x683   : > { %p967_p11 = scmp.lt.u32.totalorder %s965_s22, %s961_s29  ;;  %p969_p6 = scmp.lt.u32.totalorder %s961_s29, %s1438_s24 }
 0x684   : > { %p963_p2 = pnand %p962_p1, %p1139_p8 }
 0x685   : > { %p968_p4 = por %p967_p11, %p966_p3 }
 0x686   : > { %p964_p7 = pneg %p963_p2 }
 0x687   : > { %p970_p9 = por %p969_p6, %p968_p4 }
 0x689   : > { %p971_p12 = pnand %p970_p9, %p964_p7 }
 0x68b   : > { %974 = shalt.err (!%p971_p12)
}
 0x68c   : > { %788 = dma.vmem_to_hbm [thread:$0]  (%p1139_p8), %s1440_s9, 128, %s1438_s24, %s648_s25  }
 0x68d PF: > { %s674_s30 = sand.u32 1, %s1005_s12   ;;  %p1512_p13 = scmp.ne.s32.totalorder %s1490_s19, 0 }
 0x68e   : > { %p1513_p0 = scmp.ge.s32.totalorder %s1017_s15, 2  ;;  %s675_s4 = scalar_lea.sflag [#allocation4], %s674_s30 }
 0x690   : > { %p799_p5 = pnand %p1513_p0, %p1512_p13 }
 0x692   : > { %1000 = dma.done.wait (!%p799_p5), %s675_s4, 128  }
 0x693   : > { %1002 = vsyncadd (!%p799_p5), %s675_s4, 4294967168  ;;  %p17_p10 = scmp.ge.s32.totalorder %s1095_s23, 4   ;;  %s1514_s12 = smov %s1009_s13 }
 0x694   : > { %s1515_s13 = smov %s1013_s14  ;;  %s1516_s14 = smov %s1131_s11 }
 0x695   : > { %s1517_s15 = smov %s1095_s23  ;;  %19 = sbr.rel (!%p17_p10) target bundleno = 6 (0x6), region = 81 }
 0x69c   :  { %680 = vsyncpa [#allocation3], 1 }
 0x69d   :  { %682 = vsyncpa [#allocation3 + $0x1], 1 }
 0x69e   :  { %683 = vsyncpa [#allocation6], 1 }
 0x69f   :  { %684 = vsyncpa [#allocation4], 1 }
 0x6a0   :  { %686 = vsyncpa [#allocation4 + $0x1], 1 }

</bundles_post_ra>
